<compile_context>
chip_gen: v7x
topology: tpu7x:2x2x1
jax: 0.10.0
libtpu: 0.0.40
codegen_flags: <defaults>
</compile_context>

<pallas_src>
import functools

import jax
import jax.numpy as jnp
from jax.experimental import pallas as pl
from jax.experimental.pallas import tpu as pltpu

LANES = 128
SUB_PACK = 32  # sublane packing safe for 4/2/1-byte dtypes


def _round_up(x, m):
    return ((x + m - 1) // m) * m


def _mse_kernel(x_ref, y_ref, o_ref, acc_ref, *, total_rows, row_tile,
                inner_tiles, need_mask):
    i = pl.program_id(1)  # reduction axis

    @pl.when(i == 0)
    def _():
        acc_ref[...] = jnp.zeros_like(acc_ref)

    x = x_ref[...].astype(jnp.float32)
    y = y_ref[...].astype(jnp.float32)
    d = x - y
    d2 = d * d

    if need_mask:
        # Logical (unclamped) block index -> global row ids; rows past the real
        # array (partial last block / clamped duplicate blocks) contribute 0.
        p = pl.program_id(0)
        row0 = (p * inner_tiles + i) * row_tile
        row_ids = row0 + jax.lax.broadcasted_iota(jnp.int32, d2.shape, 0)
        d2 = jnp.where(row_ids < total_rows, d2, 0.0)

    # Per-step work stays VPU-elementwise + one sublane reduce; lane reduce is
    # deferred to the wrapper epilogue.
    acc_ref[...] += jnp.sum(d2, axis=0, keepdims=True)

    @pl.when(i == pl.num_programs(1) - 1)
    def _():
        o_ref[...] = acc_ref[...][None]  # (1,128) -> (1,1,128)


def mse_loss_pallas(x, gt, *, row_tile=2048, num_parallel=2):
    """Equivalent of nn.MSELoss()(x, gt) (mean reduction). Returns f32 scalar."""
    assert x.shape == gt.shape, "MSELoss requires matching shapes"
    assert row_tile % SUB_PACK == 0
    n_elems = x.size

    xf = jnp.ravel(x)
    yf = jnp.ravel(gt)

    # Align the flat length to (32 sublanes x 128 lanes) so the 2-D view is
    # tile-aligned for any dtype. Zero padding in BOTH arrays -> zero diff.
    # TODO(synk): for lengths not already 4096-aligned this still copies; a
    # fully copy-free tail would need manual DMA of a ragged remainder.
    pad = (-n_elems) % (SUB_PACK * LANES)
    if pad:
        xf = jnp.pad(xf, (0, pad))
        yf = jnp.pad(yf, (0, pad))

    rows = xf.size // LANES
    x2d = xf.reshape(rows, LANES)
    y2d = yf.reshape(rows, LANES)

    rt = min(row_tile, rows)                      # multiple of 32 either way
    n_blocks = pl.cdiv(rows, rt)
    num_par = max(1, min(num_parallel, n_blocks))  # outer parallel axis
    inner = pl.cdiv(n_blocks, num_par)             # reduction tiles per slice
    need_mask = (num_par * inner * rt) != rows

    kernel = functools.partial(
        _mse_kernel,
        total_rows=rows,
        row_tile=rt,
        inner_tiles=inner,
        need_mask=need_mask,
    )

    def in_map(p, i):
        # Clamp so duplicated tail blocks never index past the array; their
        # contribution is zeroed by the in-kernel row mask.
        blk = jnp.minimum(p * inner + i, n_blocks - 1)
        return (blk, 0)

    bytes_accessed = int(x2d.nbytes) + int(y2d.nbytes) + num_par * LANES * 4

    partials = pl.pallas_call(
        kernel,
        out_shape=jax.ShapeDtypeStruct((num_par, 1, LANES), jnp.float32),
        grid_spec=pltpu.PrefetchScalarGridSpec(
            num_scalar_prefetch=0,
            grid=(num_par, inner),
            in_specs=[
                pl.BlockSpec((rt, LANES), in_map),
                pl.BlockSpec((rt, LANES), in_map),
            ],
            out_specs=pl.BlockSpec((1, 1, LANES), lambda p, i: (p, 0, 0)),
            scratch_shapes=[pltpu.VMEM((1, LANES), jnp.float32)],
        ),
        compiler_params=pltpu.CompilerParams(
            dimension_semantics=("parallel", "arbitrary"),
        ),
        cost_estimate=pl.CostEstimate(
            flops=3 * n_elems,
            transcendentals=0,
            bytes_accessed=bytes_accessed,
        ),
    )(x2d, y2d)

    # Final cross-lane / cross-core reduce + mean in the wrapper (tiny).
    return jnp.sum(partials) / n_elems


if __name__ == "__main__":
    key = jax.random.PRNGKey(0)
    k1, k2 = jax.random.split(key)

    # Small NCHW shapes consistent with a typical loss call.
    x = jax.random.normal(k1, (2, 4, 16, 16), dtype=jnp.float32)
    gt = jax.random.normal(k2, (2, 4, 16, 16), dtype=jnp.float32)

    result = mse_loss_pallas(x, gt)
    jax.block_until_ready(result)
    ref = jnp.mean((x - gt) ** 2)
    assert jnp.allclose(result, ref, rtol=1e-5, atol=1e-6), (result, ref)

    # Second check: non-tile-aligned size, exercises multi-block path,
    # the parallel axis and the in-kernel tail masking.
    k3, k4 = jax.random.split(k2)
    x2 = jax.random.normal(k3, (2, 4, 200, 200), dtype=jnp.float32)
    gt2 = jax.random.normal(k4, (2, 4, 200, 200), dtype=jnp.float32)
    result2 = mse_loss_pallas(x2, gt2)
    jax.block_until_ready(result2)
    ref2 = jnp.mean((x2 - gt2) ** 2)
    assert jnp.allclose(result2, ref2, rtol=1e-5, atol=1e-6), (result2, ref2)

    print("KERNEL_OK")
</pallas_src>

<mosaic_0001>
module attributes {stable_mosaic.version = 11 : i64} {
  func.func @_mse_kernel(%arg0: i32, %arg1: i32, %arg2: memref<32x128xf32, #tpu.memory_space<vmem>>, %arg3: memref<32x128xf32, #tpu.memory_space<vmem>>, %arg4: memref<1x1x128xf32, #tpu.memory_space<vmem>>, %arg5: memref<1x128xf32, #tpu.memory_space<vmem>>) attributes {dimension_semantics = [#tpu.dimension_semantics<parallel>, #tpu.dimension_semantics<arbitrary>], iteration_bounds = array<i64: 1, 1>, scalar_prefetch = 0 : i64, scratch_operands = 1 : i64, tpu.core_type = #tpu.core_type<tc>, window_params = [{transform_indices = @transform_0, window_bounds = array<i64: 32, 128>}, {transform_indices = @transform_1, window_bounds = array<i64: 32, 128>}, {transform_indices = @transform_2, window_bounds = array<i64: 1, 1, 128>}]} {
    %c0_i32 = arith.constant 0 : i32
    %0 = arith.cmpi eq, %arg1, %c0_i32 : i32
    %1 = arith.extui %0 : i1 to i32
    %c0_i32_0 = arith.constant 0 : i32
    %2 = arith.cmpi ne, %1, %c0_i32_0 : i32
    scf.if %2 {
      %cst_10 = arith.constant 0.000000e+00 : f32
      %15 = vector.broadcast %cst_10 : f32 to vector<1x128xf32>
      %c0_11 = arith.constant 0 : index
      %c0_12 = arith.constant 0 : index
      %16 = vector.load %arg5[%c0_11, %c0_12] : memref<1x128xf32, #tpu.memory_space<vmem>>, vector<1x128xf32>
      tpu.vector_store %arg5[%c0_11, %c0_12], %15 {strides = array<i32>} : memref<1x128xf32, #tpu.memory_space<vmem>>, vector<1x128xf32>,
    } else {
    }
    %c0 = arith.constant 0 : index
    %c0_1 = arith.constant 0 : index
    %3 = vector.load %arg2[%c0, %c0_1] : memref<32x128xf32, #tpu.memory_space<vmem>>, vector<32x128xf32>
    %c0_2 = arith.constant 0 : index
    %c0_3 = arith.constant 0 : index
    %4 = vector.load %arg3[%c0_2, %c0_3] : memref<32x128xf32, #tpu.memory_space<vmem>>, vector<32x128xf32>
    %5 = arith.subf %3, %4 : vector<32x128xf32>
    %6 = arith.mulf %5, %5 : vector<32x128xf32>
    %c0_4 = arith.constant 0 : index
    %c0_5 = arith.constant 0 : index
    %7 = vector.load %arg5[%c0_4, %c0_5] : memref<1x128xf32, #tpu.memory_space<vmem>>, vector<1x128xf32>
    %cst = arith.constant dense<0.000000e+00> : vector<128xf32>
    %8 = vector.multi_reduction <add>, %6, %cst [0] : vector<32x128xf32> to vector<128xf32>
    %9 = vector.shape_cast %8 : vector<128xf32> to vector<1x128xf32>
    %10 = arith.addf %7, %9 : vector<1x128xf32>
    %c0_6 = arith.constant 0 : index
    %c0_7 = arith.constant 0 : index
    %11 = vector.load %arg5[%c0_6, %c0_7] : memref<1x128xf32, #tpu.memory_space<vmem>>, vector<1x128xf32>
    tpu.vector_store %arg5[%c0_6, %c0_7], %10 {strides = array<i32>} : memref<1x128xf32, #tpu.memory_space<vmem>>, vector<1x128xf32>,
    %c0_i32_8 = arith.constant 0 : i32
    %12 = arith.cmpi eq, %arg1, %c0_i32_8 : i32
    %13 = arith.extui %12 : i1 to i32
    %c0_i32_9 = arith.constant 0 : i32
    %14 = arith.cmpi ne, %13, %c0_i32_9 : i32
    scf.if %14 {
      %c0_10 = arith.constant 0 : index
      %c0_11 = arith.constant 0 : index
      %15 = vector.load %arg5[%c0_10, %c0_11] : memref<1x128xf32, #tpu.memory_space<vmem>>, vector<1x128xf32>
      %16 = vector.shape_cast %15 : vector<1x128xf32> to vector<1x1x128xf32>
      %c0_12 = arith.constant 0 : index
      %c0_13 = arith.constant 0 : index
      %c0_14 = arith.constant 0 : index
      %17 = vector.load %arg4[%c0_12, %c0_13, %c0_14] : memref<1x1x128xf32, #tpu.memory_space<vmem>>, vector<1x1x128xf32>
      tpu.vector_store %arg4[%c0_12, %c0_13, %c0_14], %16 {strides = array<i32>} : memref<1x1x128xf32, #tpu.memory_space<vmem>>, vector<1x1x128xf32>,
    } else {
    }
    return
  }
  func.func @transform_0(%arg0: i32, %arg1: i32) -> (i32, i32) {
    %c1_i32 = arith.constant 1 : i32
    %0 = arith.muli %arg0, %c1_i32 : i32
    %1 = arith.addi %0, %arg1 : i32
    %c0_i32 = arith.constant 0 : i32
    %2 = arith.minsi %1, %c0_i32 : i32
    %c0_i32_0 = arith.constant 0 : i32
    %c0_i32_1 = arith.constant 0 : i32
    return %2, %c0_i32_0 : i32, i32
  }
  func.func @transform_1(%arg0: i32, %arg1: i32) -> (i32, i32) {
    %c1_i32 = arith.constant 1 : i32
    %0 = arith.muli %arg0, %c1_i32 : i32
    %1 = arith.addi %0, %arg1 : i32
    %c0_i32 = arith.constant 0 : i32
    %2 = arith.minsi %1, %c0_i32 : i32
    %c0_i32_0 = arith.constant 0 : i32
    %c0_i32_1 = arith.constant 0 : i32
    return %2, %c0_i32_0 : i32, i32
  }
  func.func @transform_2(%arg0: i32, %arg1: i32) -> (i32, i32, i32) {
    %c0_i32 = arith.constant 0 : i32
    %c0_i32_0 = arith.constant 0 : i32
    %c0_i32_1 = arith.constant 0 : i32
    return %arg0, %c0_i32, %c0_i32_0 : i32, i32, i32
  }
}

</mosaic_0001>

<bundles_post_ra>
// kernel: tpu_custom_call.1
= control target key start
LH: loop header
LB: loop body
LE: loop exit
PB: predicated region body
PF: predicated region fallthrough
CT: control target
= control target key end

     0   :  { %7 = vsyncpa [#allocation4], 0  ;;  %s253_s0 = inlined_call_operand.hbm [shape: f32[32,128], index: 0, kind: input, shape index: {}]   ;;  %s254_s1 = inlined_call_operand.hbm [shape: f32[32,128], index: 1, kind: input, shape index: {}]   ;;  %s255_s2 = inlined_call_operand.hbm [shape: f32[1,1,128], index: 2, kind: output, shape index: {}]  }
   0x1   :  { %8 = vsyncpa [#allocation7], 0 }
   0x2   :  { %9 = vsyncpa [#allocation5], 0  ;;  %s196_s9 = smov [#allocation3]   ;;  %s124_s13 = scalar_lea.hbm %s253_s0, 512 }
   0x3   :  { %s21_s10 = sshll.u32 %s196_s9, 4  ;;  %p125_p0 = scmp.ne.s32.totalorder %s253_s0, %s124_s13  ;;  %s22_s10 = int_to_ptr.vmem [resolvable:$true] %s21_s10 }
   0x4   :  { %p128_p1 = scmp.lt.u32.totalorder %s124_s13, %s253_s0 }
   0x6   :  { %p130_p2 = pnand %p128_p1, %p125_p0 }
   0x8   :  { %133 = shalt.err (!%p130_p2)
}
   0x9   :  { %s134_s18 = scalar_lea.vmem %s22_s10, 512  ;;  %p139_p4 = scmp.lt.s32.totalorder %s22_s10, %s22_s10 }
   0xa   :  { %p135_p3 = scmp.ne.s32.totalorder %s22_s10, %s134_s18  ;;  %p140_p5 = scmp.lt.s32.totalorder %s134_s18, %s134_s18 }
   0xc   :  { %p141_p6 = por %p140_p5, %p139_p4 }
   0xe   :  { %p142_p7 = pnand %p141_p6, %p135_p3 }
  0x10   :  { %145 = shalt.err (!%p142_p7)
}
  0x11   :  { %s197_s19 = smov 128   ;;  %s198_s20 = smov 8  }
  0x12   :  { %27 = dma.hbm_to_vmem [thread:$0]  %s253_s0, 512, %s22_s10, [#allocation4], %s197_s19, %s197_s19, %s198_s20  }
  0x13   :  { %s199_s23 = smov [#allocation6]   ;;  %s146_s27 = scalar_lea.hbm %s254_s1, 512 }
  0x14   :  { %s39_s24 = sshll.u32 %s199_s23, 4  ;;  %p147_p8 = scmp.ne.s32.totalorder %s254_s1, %s146_s27  ;;  %s40_s24 = int_to_ptr.vmem [resolvable:$true] %s39_s24 }
  0x15   :  { %p150_p9 = scmp.lt.u32.totalorder %s146_s27, %s254_s1 }
  0x17   :  { %p152_p10 = pnand %p150_p9, %p147_p8 }
  0x19   :  { %155 = shalt.err (!%p152_p10)
}
  0x1a   :  { %s156_s4 = scalar_lea.vmem %s40_s24, 512  ;;  %p161_p12 = scmp.lt.s32.totalorder %s40_s24, %s40_s24 }
  0x1b   :  { %p157_p11 = scmp.ne.s32.totalorder %s40_s24, %s156_s4  ;;  %p162_p13 = scmp.lt.s32.totalorder %s156_s4, %s156_s4 }
  0x1d   :  { %p163_p0 = por %p162_p13, %p161_p12 }
  0x1f   :  { %p164_p1 = pnand %p163_p0, %p157_p11 }
  0x21   :  { %167 = shalt.err (!%p164_p1)
}
  0x22   :  { %45 = dma.hbm_to_vmem [thread:$0]  %s254_s1, 512, %s40_s24, [#allocation7], %s197_s19, %s197_s19, %s198_s20  }
  0x23   :  { %190 = dma.done.wait [#allocation4], 512  }
  0x24   :  { %191 = vsyncadd [#allocation4], 4294966784 }
  0x25   :  { %192 = dma.done.wait [#allocation7], 512  }
  0x26   :  { %193 = vsyncadd [#allocation7], 4294966784  ;;  %v200_v0 = vmov 0.0   ;;  %v65_v1 = vld [vmem:[#allocation3] sm:$0xff]  ;;  %v66_v2 = vld [vmem:[#allocation3 + $0x8] sm:$0xff]  ;;  %s201_s1 = smov [#allocation8]  }
  0x27   :  { %64 = vst [vmem:[#allocation2] sm:$0x1] %v200_v0  ;;  %v67_v3 = vld [vmem:[#allocation3 + $0x10] sm:$0xff]  ;;  %v68_v4 = vld [vmem:[#allocation3 + $0x18] sm:$0xff]  ;;  %v69_v5 = vld [vmem:[#allocation6] sm:$0xff]  ;;  %s104_s6 = sshll.u32 %s201_s1, 4  ;;  %s105_s6 = int_to_ptr.vmem [resolvable:$true] %s104_s6 }
  0x28   :  { %v70_v6 = vld [vmem:[#allocation6 + $0x8] sm:$0xff]  ;;  %v71_v7 = vld [vmem:[#allocation6 + $0x10] sm:$0xff]  ;;  %v72_v8 = vld [vmem:[#allocation6 + $0x18] sm:$0xff]  ;;  %v73_v9 = vsub.f32 %v65_v1, %v69_v5  ;;  %s168_s7 = scalar_lea.vmem %s105_s6, 16  ;;  %s172_s8 = scalar_lea.vmem %s105_s6, 32 }
  0x29   :  { %v74_v10 = vsub.f32 %v66_v2, %v70_v6  ;;  %v75_v11 = vsub.f32 %v67_v3, %v71_v7  ;;  %v76_v12 = vsub.f32 %v68_v4, %v72_v8  ;;  %p169_p2 = scmp.ne.s32.totalorder %s105_s6, %s168_s7  ;;  %p173_p3 = scmp.lt.s32.totalorder %s105_s6, %s105_s6 }
  0x2a   :  { %v77_v13 = vmul.f32 %v73_v9, %v73_v9  ;;  %p174_p4 = scmp.lt.s32.totalorder %s172_s8, %s168_s7 }
  0x2b   :  { %v78_v14 = vmul.f32 %v74_v10, %v74_v10  ;;  %v79_v15 = vmul.f32 %v75_v11, %v75_v11  ;;  %v80_v16 = vmul.f32 %v76_v12, %v76_v12 }
  0x2c   :  { %p175_p5 = por %p174_p4, %p173_p3 }
  0x2d   :  { %v82_v17 = vadd.f32 %v78_v14, %v77_v13 }
  0x2e   :  { %v81_v25 = vld [vmem:[#allocation2] sm:$0x1]  ;;  %p176_p6 = pnand %p175_p5, %p169_p2 }
  0x2f   :  { %v83_v18 = vadd.f32 %v82_v17, %v79_v15 }
  0x31   :  { %v84_v19 = vadd.f32 %v83_v18, %v80_v16 }
  0x33   :  { %v85_v20 = vrot.slane %v84_v19, 4 }
  0x35   :  { %v86_v21 = vadd.f32 %v85_v20, %v84_v19 }
  0x37   :  { %v87_v22 = vrot.slane %v86_v21, 2 }
  0x39   :  { %v88_v23 = vadd.f32 %v87_v22, %v86_v21 }
  0x3b   :  { %v89_v24 = vrot.slane %v88_v23, 1 }
  0x3d   :  { %v90_v26 = vadd.f32 %v89_v24, %v88_v23 }
  0x3f   :  { %v91_v27 = vadd.f32 %v90_v26, %v81_v25 }
  0x41   :  { %92 = vst [vmem:[#allocation2] sm:$0x1] %v91_v27 }
  0x48   :  { %v96_v28 = vld [vmem:[#allocation2] sm:$0x1] }
  0x49   :  { %97 = vst [vmem:[#allocation8] sm:$0x1] %v96_v28 }
  0x4a   :  { %179 = shalt.err (!%p176_p6)
}
  0x4b   :  { %s180_s11 = scalar_lea.hbm %s255_s2, 16 }
  0x4c   :  { %p181_p7 = scmp.ne.s32.totalorder %s255_s2, %s180_s11  ;;  %p184_p8 = scmp.lt.u32.totalorder %s180_s11, %s255_s2 }
  0x4e   :  { %p186_p9 = pnand %p184_p8, %p181_p7 }
  0x50   :  { %189 = shalt.err (!%p186_p9)
}
  0x51   :  { %107 = dma.vmem_to_hbm [thread:$0]  %s105_s6, 16, %s255_s2, [#allocation5]  }
  0x52   :  { %194 = dma.done.wait [#allocation5], 16  }
  0x53   :  { %195 = vsyncadd [#allocation5], 4294967280 }
  0x54   :  { %111 = vsyncpa [#allocation4], 1 }
  0x55   :  { %112 = vsyncpa [#allocation7], 1 }
  0x56   :  { %113 = vsyncpa [#allocation5], 1 }

</bundles_post_ra>
